<compile_context>
chip_gen: v5e
topology: v5e:2x2
jax: 0.10.0
libtpu: 0.0.40
codegen_flags: <defaults>
</compile_context>

<pallas_src>
import math

import jax
import jax.numpy as jnp
from jax.experimental import pallas as pl
from jax.experimental.pallas import tpu as pltpu

MEAN_MIN, MEAN_MAX = -9.0, 9.0
LOG_STD_MIN, LOG_STD_MAX = -5.0, 2.0
_HALF_LOG_2PI = 0.5 * math.log(2.0 * math.pi)
_LOG_2 = math.log(2.0)

_OUT_W = 128  # lane-dense output slab width (one full vreg lane extent)


def _guide_policy_kernel(state_ref, eps_ref,
                         w1_ref, b1_ref, w2_ref, b2_ref,
                         wh_ref, bh_ref,
                         out_ref):
    s = state_ref[...]
    eps = eps_ref[...]
    S = s.shape[-1]  # static (block shape)

    # fc1 + relu, fc2 + relu.
    # NOTE: if hidden_num is ever scaled up (>=256), cast activations/weights
    # to bf16 here (keep preferred_element_type=f32) for MXU-native speed.
    h1 = jnp.dot(s, w1_ref[...], preferred_element_type=jnp.float32) + b1_ref[...]
    h1 = jnp.maximum(h1, 0.0)
    h2 = jnp.dot(h1, w2_ref[...], preferred_element_type=jnp.float32) + b2_ref[...]
    h2 = jnp.maximum(h2, 0.0)

    # Fused mu/sigma head: one [TB, 2*S] matmul instead of two [TB, S] ones.
    head = jnp.dot(h2, wh_ref[...], preferred_element_type=jnp.float32) + bh_ref[...]
    mu = jnp.clip(head[:, :S], MEAN_MIN, MEAN_MAX)
    log_sigma = jnp.clip(head[:, S:], LOG_STD_MIN, LOG_STD_MAX)
    sigma = jnp.exp(log_sigma)

    # rsample of TransformedDistribution(Normal(mu, sigma), TanhTransform):
    # x is the pre-tanh sample (the TanhTransform cache), action = tanh(x).
    x = mu + sigma * eps
    action = jnp.tanh(x)

    # Normal log-prob at x, using (x - mu)/sigma == eps.
    normal_lp = -0.5 * eps * eps - log_sigma - _HALF_LOG_2PI
    # TanhTransform.log_abs_det_jacobian(x) = 2*(log2 - x - softplus(-2x))
    #                                       = 2*(log2 - |x| - log1p(exp(-2|x|)))
    ax = jnp.abs(x)
    log_det = 2.0 * (_LOG_2 - ax - jnp.log1p(jnp.exp(-2.0 * ax)))
    logp = jnp.sum(normal_lp - log_det, axis=-1, keepdims=True)

    mode = jnp.tanh(mu)

    # Pack everything into one lane-dense (TB, 128) slab: a single dense HBM
    # writeback stream instead of three narrow masked output streams.
    out_ref[...] = jnp.zeros_like(out_ref)
    out_ref[:, 0:S] = action
    out_ref[:, S:2 * S] = mode
    out_ref[:, 2 * S:2 * S + 1] = logp


def _pick_tb(batch):
    # Prefer a row tile that (a) is a multiple of 8 sublanes and (b) leaves
    # >= 2 grid steps so the "parallel" grid axis can be split across v7x's
    # two TensorCores.  Capping the tile at 256 rows keeps the double-buffered
    # per-step VMEM (~2*(2*TB*S) + 2*TB*128 f32) trivially below v7x's 64 MiB
    # (and v5e/v6e's 128 MiB); weights are only a few KiB and stay resident.
    for tb in (256, 128, 64, 32, 16, 8):
        if batch % tb == 0 and batch // tb >= 2:
            return tb
    return batch  # single tile; block shape equals full array dims (legal)


def guide_policy_forward(state, eps, params):
    """state, eps: [B, S] float32 (eps ~ N(0,1) drives the reparameterized sample).

    Returns (action [B, S], logp_pi [B], a_tanh_mode [B, S]), matching the
    PyTorch module's forward().
    """
    B, S = state.shape
    assert 2 * S + 1 <= _OUT_W, "state_dim too large for the packed output slab"

    # Fuse the mu / sigma heads into a single [H, 2*S] weight / [1, 2*S] bias.
    w_head = jnp.concatenate([params["wmu"], params["wsig"]], axis=1)
    b_head = jnp.concatenate([params["bmu"], params["bsig"]], axis=1)

    TB = _pick_tb(B)
    grid = (B // TB,)

    # Weights/biases: whole-array, resident in VMEM for the entire grid
    # (total ~(S*H + H*H + 2*H*S + 4*H)*4 bytes, a few KiB) -> no per-step DMA.
    resident = pl.BlockSpec(memory_space=pltpu.MemorySpace.VMEM)
    row_tiled = lambda width: pl.BlockSpec((TB, width), lambda i: (i, 0))

    slab = pl.pallas_call(
        _guide_policy_kernel,
        grid=grid,
        in_specs=[
            row_tiled(S),        # state
            row_tiled(S),        # eps
            resident, resident,  # fc1 w, b
            resident, resident,  # fc2 w, b
            resident, resident,  # fused (mu|sigma) head w, b
        ],
        out_specs=row_tiled(_OUT_W),
        out_shape=jax.ShapeDtypeStruct((B, _OUT_W), jnp.float32),
        compiler_params=pltpu.CompilerParams(
            dimension_semantics=("parallel",)),
    )(state, eps,
      params["w1"], params["b1"], params["w2"], params["b2"], w_head, b_head)

    action = slab[:, 0:S]
    a_tanh_mode = slab[:, S:2 * S]
    logp_pi = slab[:, 2 * S]
    return action, logp_pi, a_tanh_mode


def init_params(key, state_dim, hidden_num):
    """Deterministic PyTorch-style nn.Linear init: U(-1/sqrt(fan_in), 1/sqrt(fan_in))."""
    def linear(k, fan_in, fan_out):
        kw, kb = jax.random.split(k)
        bound = 1.0 / math.sqrt(fan_in)
        w = jax.random.uniform(kw, (fan_in, fan_out), jnp.float32, -bound, bound)
        b = jax.random.uniform(kb, (1, fan_out), jnp.float32, -bound, bound)
        return w, b

    k1, k2, k3, k4 = jax.random.split(key, 4)
    w1, b1 = linear(k1, state_dim, hidden_num)
    w2, b2 = linear(k2, hidden_num, hidden_num)
    wmu, bmu = linear(k3, hidden_num, state_dim)
    wsig, bsig = linear(k4, hidden_num, state_dim)
    return dict(w1=w1, b1=b1, w2=w2, b2=b2,
                wmu=wmu, bmu=bmu, wsig=wsig, bsig=bsig)


def _reference_forward(state, eps, params):
    """Pure-JAX reference matching the PyTorch forward()."""
    dot = lambda a, b: jnp.dot(a, b, precision=jax.lax.Precision.HIGHEST)
    h1 = jax.nn.relu(dot(state, params["w1"]) + params["b1"])
    h2 = jax.nn.relu(dot(h1, params["w2"]) + params["b2"])
    mu = jnp.clip(dot(h2, params["wmu"]) + params["bmu"], MEAN_MIN, MEAN_MAX)
    log_sigma = jnp.clip(dot(h2, params["wsig"]) + params["bsig"],
                         LOG_STD_MIN, LOG_STD_MAX)
    sigma = jnp.exp(log_sigma)
    x = mu + sigma * eps
    action = jnp.tanh(x)
    normal_lp = -0.5 * eps * eps - log_sigma - _HALF_LOG_2PI
    log_det = 2.0 * (_LOG_2 - x - jax.nn.softplus(-2.0 * x))
    logp = jnp.sum(normal_lp - log_det, axis=-1)
    return action, logp, jnp.tanh(mu)


if __name__ == "__main__":
    # B=16 -> TB=8, grid=(2,): both v7x TensorCores get a tile; neutral on v5e/v6e.
    B, STATE_DIM, HIDDEN = 16, 8, 32

    key = jax.random.PRNGKey(0)
    k_params, k_state, k_eps = jax.random.split(key, 3)

    params = init_params(k_params, STATE_DIM, HIDDEN)
    state = jax.random.normal(k_state, (B, STATE_DIM), jnp.float32)
    eps = jax.random.normal(k_eps, (B, STATE_DIM), jnp.float32)

    action, logp_pi, a_tanh_mode = guide_policy_forward(state, eps, params)
    jax.block_until_ready((action, logp_pi, a_tanh_mode))

    assert action.shape == (B, STATE_DIM)
    assert logp_pi.shape == (B,)
    assert a_tanh_mode.shape == (B, STATE_DIM)

    ref_action, ref_logp, ref_mode = _reference_forward(state, eps, params)
    assert jnp.allclose(action, ref_action, atol=1e-4, rtol=1e-4)
    assert jnp.allclose(a_tanh_mode, ref_mode, atol=1e-4, rtol=1e-4)
    assert jnp.allclose(logp_pi, ref_logp, atol=1e-4, rtol=1e-4)

    print("KERNEL_OK")
</pallas_src>

<mosaic_0001>
module attributes {stable_mosaic.version = 11 : i64} {
  func.func @_guide_policy_kernel(%arg0: i32, %arg1: memref<8x8xf32, #tpu.memory_space<vmem>>, %arg2: memref<8x8xf32, #tpu.memory_space<vmem>>, %arg3: memref<8x32xf32, #tpu.memory_space<vmem>>, %arg4: memref<1x32xf32, #tpu.memory_space<vmem>>, %arg5: memref<32x32xf32, #tpu.memory_space<vmem>>, %arg6: memref<1x32xf32, #tpu.memory_space<vmem>>, %arg7: memref<32x16xf32, #tpu.memory_space<vmem>>, %arg8: memref<1x16xf32, #tpu.memory_space<vmem>>, %arg9: memref<8x128xf32, #tpu.memory_space<vmem>>) attributes {dimension_semantics = [#tpu.dimension_semantics<parallel>], iteration_bounds = array<i64: 2>, scalar_prefetch = 0 : i64, scratch_operands = 0 : i64, tpu.core_type = #tpu.core_type<tc>, window_params = [{transform_indices = @transform_0, window_bounds = array<i64: 8, 8>}, {transform_indices = @transform_1, window_bounds = array<i64: 8, 8>}, {pipeline_mode = #tpu.pipeline_mode<synchronous>, transform_indices = @transform_2, window_bounds = array<i64: 8, 32>}, {pipeline_mode = #tpu.pipeline_mode<synchronous>, transform_indices = @transform_3, window_bounds = array<i64: 1, 32>}, {pipeline_mode = #tpu.pipeline_mode<synchronous>, transform_indices = @transform_4, window_bounds = array<i64: 32, 32>}, {pipeline_mode = #tpu.pipeline_mode<synchronous>, transform_indices = @transform_5, window_bounds = array<i64: 1, 32>}, {pipeline_mode = #tpu.pipeline_mode<synchronous>, transform_indices = @transform_6, window_bounds = array<i64: 32, 16>}, {pipeline_mode = #tpu.pipeline_mode<synchronous>, transform_indices = @transform_7, window_bounds = array<i64: 1, 16>}, {transform_indices = @transform_8, window_bounds = array<i64: 8, 128>}]} {
    %c0 = arith.constant 0 : index
    %c0_0 = arith.constant 0 : index
    %0 = vector.load %arg1[%c0, %c0_0] : memref<8x8xf32, #tpu.memory_space<vmem>>, vector<8x8xf32>
    %c0_1 = arith.constant 0 : index
    %c0_2 = arith.constant 0 : index
    %1 = vector.load %arg2[%c0_1, %c0_2] : memref<8x8xf32, #tpu.memory_space<vmem>>, vector<8x8xf32>
    %c0_3 = arith.constant 0 : index
    %c0_4 = arith.constant 0 : index
    %2 = vector.load %arg3[%c0_3, %c0_4] : memref<8x32xf32, #tpu.memory_space<vmem>>, vector<8x32xf32>
    %cst = arith.constant dense<0.000000e+00> : vector<8x32xf32>
    %3 = tpu.matmul %0, %2, %cst {dimension_numbers = #tpu.dot_dimension_numbers<[1], [0], [0], [1], [0, 0, 1, 1], [], []>} : vector<8x8xf32>, vector<8x32xf32>, vector<8x32xf32> -> vector<8x32xf32>
    %c0_5 = arith.constant 0 : index
    %c0_6 = arith.constant 0 : index
    %4 = vector.load %arg4[%c0_5, %c0_6] : memref<1x32xf32, #tpu.memory_space<vmem>>, vector<1x32xf32>
    %5 = vector.broadcast %4 : vector<1x32xf32> to vector<8x32xf32>
    %6 = arith.addf %3, %5 : vector<8x32xf32>
    %cst_7 = arith.constant 0.000000e+00 : f32
    %7 = vector.broadcast %cst_7 : f32 to vector<8x32xf32>
    %8 = arith.maximumf %6, %7 : vector<8x32xf32>
    %c0_8 = arith.constant 0 : index
    %c0_9 = arith.constant 0 : index
    %9 = vector.load %arg5[%c0_8, %c0_9] : memref<32x32xf32, #tpu.memory_space<vmem>>, vector<32x32xf32>
    %cst_10 = arith.constant dense<0.000000e+00> : vector<8x32xf32>
    %10 = tpu.matmul %8, %9, %cst_10 {dimension_numbers = #tpu.dot_dimension_numbers<[1], [0], [0], [1], [0, 0, 1, 1], [], []>} : vector<8x32xf32>, vector<32x32xf32>, vector<8x32xf32> -> vector<8x32xf32>
    %c0_11 = arith.constant 0 : index
    %c0_12 = arith.constant 0 : index
    %11 = vector.load %arg6[%c0_11, %c0_12] : memref<1x32xf32, #tpu.memory_space<vmem>>, vector<1x32xf32>
    %12 = vector.broadcast %11 : vector<1x32xf32> to vector<8x32xf32>
    %13 = arith.addf %10, %12 : vector<8x32xf32>
    %cst_13 = arith.constant 0.000000e+00 : f32
    %14 = vector.broadcast %cst_13 : f32 to vector<8x32xf32>
    %15 = arith.maximumf %13, %14 : vector<8x32xf32>
    %c0_14 = arith.constant 0 : index
    %c0_15 = arith.constant 0 : index
    %16 = vector.load %arg7[%c0_14, %c0_15] : memref<32x16xf32, #tpu.memory_space<vmem>>, vector<32x16xf32>
    %cst_16 = arith.constant dense<0.000000e+00> : vector<8x16xf32>
    %17 = tpu.matmul %15, %16, %cst_16 {dimension_numbers = #tpu.dot_dimension_numbers<[1], [0], [0], [1], [0, 0, 1, 1], [], []>} : vector<8x32xf32>, vector<32x16xf32>, vector<8x16xf32> -> vector<8x16xf32>
    %c0_17 = arith.constant 0 : index
    %c0_18 = arith.constant 0 : index
    %18 = vector.load %arg8[%c0_17, %c0_18] : memref<1x16xf32, #tpu.memory_space<vmem>>, vector<1x16xf32>
    %19 = vector.broadcast %18 : vector<1x16xf32> to vector<8x16xf32>
    %20 = arith.addf %17, %19 : vector<8x16xf32>
    %21 = vector.extract_strided_slice %20 {offsets = [0, 0], sizes = [8, 8], strides = [1, 1]} : vector<8x16xf32> to vector<8x8xf32>
    %cst_19 = arith.constant -9.000000e+00 : f32
    %cst_20 = arith.constant 9.000000e+00 : f32
    %22 = vector.broadcast %cst_19 : f32 to vector<8x8xf32>
    %23 = arith.maximumf %22, %21 : vector<8x8xf32>
    %24 = vector.broadcast %cst_20 : f32 to vector<8x8xf32>
    %25 = arith.minimumf %24, %23 : vector<8x8xf32>
    %26 = vector.extract_strided_slice %20 {offsets = [0, 8], sizes = [8, 8], strides = [1, 1]} : vector<8x16xf32> to vector<8x8xf32>
    %cst_21 = arith.constant -5.000000e+00 : f32
    %cst_22 = arith.constant 2.000000e+00 : f32
    %27 = vector.broadcast %cst_21 : f32 to vector<8x8xf32>
    %28 = arith.maximumf %27, %26 : vector<8x8xf32>
    %29 = vector.broadcast %cst_22 : f32 to vector<8x8xf32>
    %30 = arith.minimumf %29, %28 : vector<8x8xf32>
    %31 = math.exp %30 : vector<8x8xf32>
    %32 = arith.mulf %31, %1 : vector<8x8xf32>
    %33 = arith.addf %25, %32 : vector<8x8xf32>
    %34 = math.tanh %33 : vector<8x8xf32>
    %cst_23 = arith.constant -5.000000e-01 : f32
    %35 = vector.broadcast %cst_23 : f32 to vector<8x8xf32>
    %36 = arith.mulf %35, %1 : vector<8x8xf32>
    %37 = arith.mulf %36, %1 : vector<8x8xf32>
    %38 = arith.subf %37, %30 : vector<8x8xf32>
    %cst_24 = arith.constant 0.918938517 : f32
    %39 = vector.broadcast %cst_24 : f32 to vector<8x8xf32>
    %40 = arith.subf %38, %39 : vector<8x8xf32>
    %41 = math.absf %33 : vector<8x8xf32>
    %cst_25 = arith.constant 0.693147182 : f32
    %42 = vector.broadcast %cst_25 : f32 to vector<8x8xf32>
    %43 = arith.subf %42, %41 : vector<8x8xf32>
    %cst_26 = arith.constant -2.000000e+00 : f32
    %44 = vector.broadcast %cst_26 : f32 to vector<8x8xf32>
    %45 = arith.mulf %44, %41 : vector<8x8xf32>
    %46 = math.exp %45 : vector<8x8xf32>
    %47 = math.log1p %46 : vector<8x8xf32>
    %48 = arith.subf %43, %47 : vector<8x8xf32>
    %cst_27 = arith.constant 2.000000e+00 : f32
    %49 = vector.broadcast %cst_27 : f32 to vector<8x8xf32>
    %50 = arith.mulf %49, %48 : vector<8x8xf32>
    %51 = arith.subf %40, %50 : vector<8x8xf32>
    %cst_28 = arith.constant dense<0.000000e+00> : vector<8xf32>
    %52 = vector.multi_reduction <add>, %51, %cst_28 [1] : vector<8x8xf32> to vector<8xf32>
    %53 = vector.shape_cast %52 : vector<8xf32> to vector<8x1xf32>
    %54 = math.tanh %25 : vector<8x8xf32>
    %cst_29 = arith.constant 0.000000e+00 : f32
    %55 = vector.broadcast %cst_29 : f32 to vector<8x128xf32>
    %c0_30 = arith.constant 0 : index
    %c0_31 = arith.constant 0 : index
    %56 = vector.load %arg9[%c0_30, %c0_31] : memref<8x128xf32, #tpu.memory_space<vmem>>, vector<8x128xf32>
    tpu.vector_store %arg9[%c0_30, %c0_31], %55 {strides = array<i32>} : memref<8x128xf32, #tpu.memory_space<vmem>>, vector<8x128xf32>,
    %c0_32 = arith.constant 0 : index
    %c0_33 = arith.constant 0 : index
    %57 = vector.load %arg9[%c0_32, %c0_33] : memref<8x128xf32, #tpu.memory_space<vmem>>, vector<8x8xf32>
    tpu.vector_store %arg9[%c0_32, %c0_33], %34 {strides = array<i32>} : memref<8x128xf32, #tpu.memory_space<vmem>>, vector<8x8xf32>,
    %c0_34 = arith.constant 0 : index
    %c8 = arith.constant 8 : index
    %58 = vector.load %arg9[%c0_34, %c8] : memref<8x128xf32, #tpu.memory_space<vmem>>, vector<8x8xf32>
    tpu.vector_store %arg9[%c0_34, %c8], %54 {strides = array<i32>} : memref<8x128xf32, #tpu.memory_space<vmem>>, vector<8x8xf32>,
    %c0_35 = arith.constant 0 : index
    %c16 = arith.constant 16 : index
    %59 = vector.load %arg9[%c0_35, %c16] : memref<8x128xf32, #tpu.memory_space<vmem>>, vector<8x1xf32>
    tpu.vector_store %arg9[%c0_35, %c16], %53 {strides = array<i32>} : memref<8x128xf32, #tpu.memory_space<vmem>>, vector<8x1xf32>,
    return
  }
  func.func @transform_0(%arg0: i32) -> (i32, i32) {
    %c0_i32 = arith.constant 0 : i32
    %c0_i32_0 = arith.constant 0 : i32
    return %arg0, %c0_i32 : i32, i32
  }
  func.func @transform_1(%arg0: i32) -> (i32, i32) {
    %c0_i32 = arith.constant 0 : i32
    %c0_i32_0 = arith.constant 0 : i32
    return %arg0, %c0_i32 : i32, i32
  }
  func.func @transform_2(%arg0: i32) -> (i32, i32) {
    %c0_i32 = arith.constant 0 : i32
    %c0_i32_0 = arith.constant 0 : i32
    %c0_i32_1 = arith.constant 0 : i32
    return %c0_i32, %c0_i32_0 : i32, i32
  }
  func.func @transform_3(%arg0: i32) -> (i32, i32) {
    %c0_i32 = arith.constant 0 : i32
    %c0_i32_0 = arith.constant 0 : i32
    %c0_i32_1 = arith.constant 0 : i32
    return %c0_i32, %c0_i32_0 : i32, i32
  }
  func.func @transform_4(%arg0: i32) -> (i32, i32) {
    %c0_i32 = arith.constant 0 : i32
    %c0_i32_0 = arith.constant 0 : i32
    %c0_i32_1 = arith.constant 0 : i32
    return %c0_i32, %c0_i32_0 : i32, i32
  }
  func.func @transform_5(%arg0: i32) -> (i32, i32) {
    %c0_i32 = arith.constant 0 : i32
    %c0_i32_0 = arith.constant 0 : i32
    %c0_i32_1 = arith.constant 0 : i32
    return %c0_i32, %c0_i32_0 : i32, i32
  }
  func.func @transform_6(%arg0: i32) -> (i32, i32) {
    %c0_i32 = arith.constant 0 : i32
    %c0_i32_0 = arith.constant 0 : i32
    %c0_i32_1 = arith.constant 0 : i32
    return %c0_i32, %c0_i32_0 : i32, i32
  }
  func.func @transform_7(%arg0: i32) -> (i32, i32) {
    %c0_i32 = arith.constant 0 : i32
    %c0_i32_0 = arith.constant 0 : i32
    %c0_i32_1 = arith.constant 0 : i32
    return %c0_i32, %c0_i32_0 : i32, i32
  }
  func.func @transform_8(%arg0: i32) -> (i32, i32) {
    %c0_i32 = arith.constant 0 : i32
    %c0_i32_0 = arith.constant 0 : i32
    return %arg0, %c0_i32 : i32, i32
  }
}

</mosaic_0001>

<bundles_post_ra>
// kernel: tpu_custom_call.1
= control target key start
LH: loop header
LB: loop body
LE: loop exit
PB: predicated region body
PF: predicated region fallthrough
CT: control target
= control target key end

     0   :  { %13 = vsyncpa [#allocation3], 0  ;;  %s880_s0 = inlined_call_operand.vmem [shape: f32[16,8], index: 0, kind: input, shape index: {}]   ;;  %s881_s1 = inlined_call_operand.vmem [shape: f32[16,8], index: 1, kind: input, shape index: {}]   ;;  %s882_s2 = inlined_call_operand.vmem [shape: f32[8,32], index: 2, kind: input, shape index: {}]   ;;  %s883_s3 = inlined_call_operand.vmem [shape: f32[1,32], index: 3, kind: input, shape index: {}]   ;;  %s884_s4 = inlined_call_operand.vmem [shape: f32[32,32], index: 4, kind: input, shape index: {}]   ;;  %s885_s5 = inlined_call_operand.vmem [shape: f32[1,32], index: 5, kind: input, shape index: {}]   ;;  %s886_s6 = inlined_call_operand.vmem [shape: f32[32,16], index: 6, kind: input, shape index: {}]   ;;  %s887_s7 = inlined_call_operand.vmem [shape: f32[1,16], index: 7, kind: input, shape index: {}]   ;;  %s888_s8 = inlined_call_operand.hbm [shape: f32[16,128], index: 8, kind: output, shape index: {}]  }
   0x1   :  { %15 = vsyncpa [#allocation3 + $0x1], 0  ;;  %s740_s27 = smov 0   ;;  %s742_s28 = smov 0  }
   0x2   :  { %s744_s29 = smov 0   ;;  %s746_s30 = smov 0  }
   0x3 LB: > { %s761_s9 = sadd.s32 4294967295, %s690_s30   ;;  %s557_s10 = sadd.s32 4294967294, %s690_s30   ;;  %s690_s30 = sphi %s746_s30, %s894_s30   ;;  %s686_s29 = sphi %s744_s29, %s893_s29   ;;  %s682_s28 = sphi %s742_s28, %s892_s28   ;;  %s678_s27 = sphi %s740_s27, %s891_s27  }
   0x4   : > { %s765_s11 = sadd.s32 1, %s690_s30   ;;  %s206_s12 = sadd.s32 1, %s686_s29 }
   0x5   : > { %s203_s13 = ssub.s32 %s690_s30, %s765_s11  ;;  %p216_p0 = scmp.ne.s32.totalorder %s686_s29, %s682_s28 }
   0x6   : > { %p204_p1 = scmp.eq.s32.totalorder %s203_s13, 0  ;;  %p217_p2 = scmp.eq.s32.totalorder %s761_s9, 1 }
   0x7   : > { %p222_p3 = scmp.ne.s32.totalorder %s682_s28, %s678_s27  ;;  %p223_p4 = scmp.eq.s32.totalorder %s557_s10, 1 }
   0x8   : > { %s776_s14 = scalar_select %p204_p1, %s686_s29, %s206_s12  }
   0x9   : > { %p778_p5 = por %p217_p2, %p216_p0  ;;  %p782_p6 = por %p223_p4, %p222_p3 }
   0xa   : > { %p560_p7 = scmp.ge.s32.totalorder %s690_s30, 1  ;;  %p273_p8 = scmp.lt.s32.totalorder %s690_s30, 3 }
   0xc   : > { %p274_p9 = pnand %p560_p7, %p273_p8 }
   0xd   : > { %p310_p10 = scmp.lt.s32.totalorder (!%p274_p9), %s761_s9, 1  ;;  %s692_s20 = smov (!%p274_p9), 8  }
   0xe   : > { %277 = sbr.rel (%p274_p9) target bundleno = 701 (0x2bd), region = 52  ;;  %s307_s26 = sand.u32 (!%p274_p9), 1, %s682_s28  }
   0xf   : > { %s561_s10 = sshll.u32 (!%p274_p9), %s307_s26, 3  ;;  %s570_s13 = sshll.u32 (!%p274_p9), %s761_s9, 3 }
  0x10   : > { %s838_s12 = scalar_lea.vmem (!%p274_p9), [#allocation2], %s561_s10  ;;  %s481_s19 = scalar_lea.hbm (!%p274_p9), %s888_s8, %s570_s13 }
  0x11   : > { %s471_s23 = scalar_lea.sflag (!%p274_p9), [#allocation3], %s307_s26  ;;  %s648_s10 = scalar_lea.hbm (!%p274_p9), %s888_s8, 16 }
  0x13   : > { %v320_v0 = vld [vmem:[%s882_s2] sm:$0xff]  ;;  %v353_v1 = vld [vmem:[%s884_s4 + $0x18] sm:$0xff]  ;;  %s311_s21 = scalar_select %p310_p10, %s761_s9, 1  ;;  %vm325_vm0 = vcmask 64512   ;;  %v352_v3 = vld [vmem:[%s884_s4 + $0x10] sm:$0xff]  ;;  %vm358_vm1 = vcmask 261120  }
  0x14   : > { %344 = vmatpush.msra.mxu0 %v320_v0  ;;  %374 = vmatpush.msra.mxu1 %v353_v1  ;;  %v351_v4 = vld [vmem:[%s884_s4 + $0x8] sm:$0xff]  ;;  %v350_v5 = vld [vmem:[%s884_s4] sm:$0xff]  ;;  %v386_v6 = vld [vmem:[%s886_s6 + $0x18] sm:$0xff]  ;;  %v694_v30 = vmov 0.0   ;;  %vm466_vm2 = vcmask 130112   ;;  %vm468_vm4 = vcmask 138368  }
  0x15   : > { %s562_s22 = sshll.u32 %s311_s21, 3  ;;  %406 = vmatpush.msra.mxu2 %v386_v6  ;;  %v615_v7 = vld [vmem:[%s883_s3] ss:$0 sm:$0xff]  ;;  %v385_v11 = vld [vmem:[%s886_s6 + $0x10] sm:$0xff]  ;;  %v384_v12 = vld [vmem:[%s886_s6 + $0x8] sm:$0xff]  ;;  %460 = vst [vmem:[%s838_s12] sm:$0xff] %v694_v30  ;;  %s485_s21 = sshll.u32 %s481_s19, 4  ;;  %s486_s21 = int_to_ptr.hbm [resolvable:$true] %s485_s21 }
  0x16   : > { %s313_s25 = scalar_lea.vmem %s880_s0, %s562_s22  ;;  %375 = vmatpush.msra.mxu1 %v352_v3  ;;  %s317_s17 = scalar_lea.vmem %s881_s1, %s562_s22  ;;  %v383_v13 = vld [vmem:[%s886_s6] sm:$0xff] }
  0x17   : > { %v318_v2 = vld [vmem:[%s313_s25] sm:$0xff]  ;;  %407 = vmatpush.msra.mxu2 %v385_v11  ;;  %s693_s22 = smov 120   ;;  %s642_s24 = sshra.s32 %s486_s21, 4  ;;  %s643_s24 = int_to_ptr.hbm [resolvable:$true] %s642_s24 }
  0x18   : > { %564 = vmatmul.msk.f32.vlgmr.msra.gmra.mxu0 %vm325_vm0, %v318_v2  ;;  %376 = vmatpush.msra.mxu1 %v351_v4  ;;  %v319_v14 = vld [vmem:[%s317_s17] sm:$0xff]  ;;  %s644_s25 = scalar_lea.hbm %s643_s24, 8  ;;  %p649_p0 = scmp.lt.s32.totalorder %s643_s24, %s888_s8 }
  0x19   : > { %408 = vmatpush.msra.mxu2 %v384_v12  ;;  %421 = vrot.lane.b32.xlu0 %v319_v14, %s692_s20  ;;  %v616_v15 = vld [vmem:[%s885_s5] ss:$0 sm:$0xff]  ;;  %v431_v41 = vmul.f32 -0.5, %v319_v14  ;;  %p645_p11 = scmp.ne.s32.totalorder %s643_s24, %s644_s25  ;;  %p650_p1 = scmp.lt.s32.totalorder %s648_s10, %s644_s25 }
  0x1a   : > { %377 = vmatpush.msra.mxu1 %v350_v5  ;;  %v617_v19 = vld [vmem:[%s887_s7] ss:$0 sm:$0xff] }
  0x1b   : > { %409 = vmatpush.msra.mxu2 %v383_v13  ;;  %v432_v43 = vmul.f32 %v431_v41, %v319_v14  ;;  %p646_p12 = pnand %p645_p11, %p778_p5  ;;  %p651_p2 = por %p650_p1, %p649_p0 }
  0x1d   : > { %p647_p13 = pneg %p646_p12 }
  0x1f   : > { %p652_p3 = pnand %p651_p2, %p647_p13 }
  0x8b   : > { %v422_v27 = vpop.permute.xlu0 %421 }
  0x95   : > { %v346_v8 = vpop.f32.mrf.mxu0 }
  0x96   : > { %v347_v9 = vadd.f32 %v615_v7, %v346_v8 }
  0x98   : > { %v349_v10 = vmax.f32 %v347_v9, 0.0 }
  0x9a   : > { %565 = vmatmul.msk.f32.vlgmr.msra.gmra.mxu1 %vm358_vm1, %v349_v10 }
 0x117   : > { %v379_v16 = vpop.f32.mrf.mxu1 }
 0x118   : > { %v380_v17 = vadd.f32 %v616_v15, %v379_v16 }
 0x11a   : > { %v382_v18 = vmax.f32 %v380_v17, 0.0 }
 0x11c   : > { %566 = vmatmul.msk.f32.vlgmr.msra.gmra.mxu2 %vm358_vm1, %v382_v18 }
 0x19f   : > { %v411_v20 = vpop.f32.mrf.mxu2 }
 0x1a0   : > { %v412_v21 = vadd.f32 %v617_v19, %v411_v20 }
 0x1a2   : > { %v567_v22 = vclamps-f32 %v412_v21, 9.0  ;;  %v416_v23 = vmax.f32 %v412_v21, -5.0 }
 0x1a4   : > { %618 = vtanh.f32 %v567_v22  ;;  %v417_v24 = vmin.f32 %v416_v23, 2.0 }
 0x1a6   : > { %434 = vrot.lane.b32.xlu1 %v417_v24, %s693_s22  ;;  %v418_v25 = vmul.f32 1.442695, %v417_v24 }
 0x1a8   : > { %620 = vpow2.f32 %v418_v25 }
 0x1aa   : > { %v619_v26 = vpop.eup %618 }
 0x1ab   : > { %463 = vrot.lane.b32.xlu2 %v619_v26, %s692_s20  ;;  %s483_s20 = sshll.u32 %s838_s12, 4  ;;  %s484_s20 = int_to_ptr.vmem [resolvable:$true] %s483_s20 }
 0x1ae   : > { %v621_v28 = vpop.eup %620 }
 0x1af   : > { %v424_v29 = vmul.f32 %v621_v28, %v422_v27 }
 0x1b1   : > { %426 = vrot.lane.b32.xlu0 %v424_v29, %s693_s22 }
 0x205   : > { %v464_v37 = vpop.permute.xlu2 %463 }
 0x218   : > { %v435_v45 = vpop.permute.xlu1 %434 }
 0x219   : > { %v437_v49 = vsub.f32 %v432_v43, %v435_v45 }
 0x21b   : > { %v568_v53 = vadd.f32 -0.9189385, %v437_v49 }
 0x223   : > { %v427_v31 = vpop.permute.xlu0 %426 }
 0x224   : > { %v429_v32 = vadd.f32 %v567_v22, %v427_v31 }
 0x226   : > { %622 = vtanh.f32 %v429_v32  ;;  %v439_v33 = vand.u32 2147483647, %v429_v32 }
 0x228   : > { %v441_v34 = vmul.f32 -2.0, %v439_v33  ;;  %v440_v50 = vsub.f32 0.6931472, %v439_v33 }
 0x22a   : > { %v442_v35 = vmul.f32 1.442695, %v441_v34 }
 0x22c   : > { %v623_v36 = vpop.eup %622  ;;  %624 = vpow2.f32 %v442_v35 }
 0x22d   : > { %461 = vst.msk [vmem:[%s838_s12] sm:$0xff] %vm325_vm0, %v623_v36 }
 0x22e   : > { %467 = vst.msk [vmem:[%s838_s12] sm:$0xff] %vm466_vm2, %v464_v37 }
 0x232   : > { %v625_v38 = vpop.eup %624 }
 0x233   : > { %v444_v39 = vadd.f32 1.0, %v625_v38  ;;  %v447_v40 = vmul.f32 -0.5, %v625_v38  ;;  %v450_v44 = vand.u32 2147483647, %v625_v38 }
 0x235   : > { %626 = vlog2.f32 %v444_v39  ;;  %v448_v42 = vadd.f32 1.0, %v447_v40  ;;  %vm451_vm3 = vcmp.lt.f32.partialorder %v450_v44, 0.0004427343 }
 0x237   : > { %v449_v48 = vmul.f32 %v625_v38, %v448_v42 }
 0x23b   : > { %v627_v46 = vpop.eup %626 }
 0x23c   : > { %v446_v47 = vmul.f32 0.6931472, %v627_v46 }
 0x23e   : > { %v452_v51 = vsel %vm451_vm3, %v449_v48, %v446_v47 }
 0x23f   : > { %v453_v52 = vsub.f32 %v440_v50, %v452_v51 }
 0x241   : > { %v454_v54 = vmul.f32 2.0, %v453_v52 }
 0x243   : > { %v455_v55 = vsub.f32 %v568_v53, %v454_v54 }
 0x245   : > { %v456_v56 = vsel %vm325_vm0, %v455_v55, 0.0 }
 0x246   : > { %457 = vadd.xlane.f32.xlu1 %v456_v56 }
 0x2b9   : > { %v458_v57 = vpop.xlane.xlu1 %457 }
 0x2ba   : > { %469 = vst.msk [vmem:[%s838_s12] sm:$0xff] %vm468_vm4, %v458_v57 }
 0x2bb   : > { %655 = shalt.err (!%p652_p3)
}
 0x2bc   : > { %573 = dma.vmem_to_hbm [thread:$0]  (%p778_p5), %s484_s20, 128, %s486_s21, %s471_s23  }
 0x2bd PF: > { %p579_p4 = scmp.ge.s32.totalorder %s690_s30, 2  ;;  %s497_s26 = sand.u32 1, %s678_s27  }
 0x2be   : > { %s498_s12 = scalar_lea.sflag [#allocation3], %s497_s26 }
 0x2bf   : > { %p576_p7 = pnand %p579_p4, %p782_p6 }
 0x2c1   : > { %p577_p8 = pneg %p576_p7 }
 0x2c3   : > { %673 = dma.done.wait (%p577_p8), %s498_s12, 128  }
 0x2c4   : > { %675 = vsyncadd (%p577_p8), %s498_s12, 4294967168  ;;  %p18_p9 = scmp.ge.s32.totalorder %s765_s11, 4   ;;  %s891_s27 = smov %s682_s28 }
 0x2c5   : > { %s892_s28 = smov %s686_s29  ;;  %s893_s29 = smov %s776_s14 }
 0x2c6   : > { %s894_s30 = smov %s765_s11  ;;  %20 = sbr.rel (!%p18_p9) target bundleno = 3 (0x3), region = 90 }
 0x2cb   :  { %504 = vsyncpa [#allocation3], 1 }
 0x2cc   :  { %506 = vsyncpa [#allocation3 + $0x1], 1 }

</bundles_post_ra>
